<compile_context>
chip_gen: v7x
topology: tpu7x:2x2x1
jax: 0.10.0
libtpu: 0.0.40
codegen_flags: <defaults>
</compile_context>

<pallas_src>
import math

import jax
import jax.numpy as jnp
from jax.experimental import pallas as pl
from jax.experimental.pallas import tpu as pltpu


_INV_SQRT2 = 1.0 / math.sqrt(2.0)
_TANH_C0 = math.sqrt(2.0 / math.pi)


def _round_up(x, m):
    return (x + m - 1) // m * m


def _pick_tile(n, cap):
    """Largest multiple-of-128 divisor of n (n itself a multiple of 128) <= cap."""
    if n <= cap:
        return n
    d = (cap // 128) * 128
    while d > 128 and n % d != 0:
        d -= 128
    return max(d, 128)


def _vmem_capacity_bytes():
    """Per-core VMEM capacity; falls back to 128 MiB (v5e/v6e class)."""
    try:
        info = pltpu.get_tpu_info()
        for name in ("vmem_capacity_bytes", "vmem_size_bytes", "vmem_bytes"):
            v = getattr(info, name, None)
            if v:
                return int(v)
    except Exception:
        pass
    return 128 * 1024 * 1024


def _auto_tiles(M, d_in_pad, h_pad, d_out_pad, ci, oi, vmem_cap, budget,
                sublane, acc_in_out, tile_m, tile_h, tile_k, tile_n):
    """Pick tile sizes so the projected per-step VMEM footprint fits `budget`."""
    user_m = tile_m is not None
    user_h = tile_h is not None
    user_k = tile_k is not None
    user_n = tile_n is not None

    if not user_m:
        tile_m = 512 if vmem_cap >= 96 * 2**20 else 256   # v5e/v6e vs v7x
        tile_m = min(tile_m, _round_up(M, sublane))
    tile_m = max(sublane, _round_up(tile_m, sublane))

    cap0 = 2048 if ci <= 2 else 1024
    if not user_h:
        tile_h = _pick_tile(h_pad, cap0)
    if not user_k:
        tile_k = _pick_tile(d_in_pad, cap0)
    if not user_n:
        tile_n = _pick_tile(d_out_pad, cap0)

    def footprint(tm, tk, th, tn):
        f = 2 * tm * d_in_pad * ci        # x row stripe (double-buffered)
        f += 2 * tk * th * ci             # w1 tile
        f += 2 * th * 4                   # b1
        f += 2 * th * tn * ci             # w2 tile
        f += 2 * tn * 4                   # b2
        f += 2 * tm * tn * oi             # out tile
        f += tm * th * 4                  # h accumulator (f32)
        if not acc_in_out:
            f += tm * tn * 4              # out accumulator (f32)
        return f

    while footprint(tile_m, tile_k, tile_h, tile_n) > budget:
        cands = []
        if not user_n and tile_n > 256:
            cands.append(("n", tile_n))
        if not user_k and tile_k > 256:
            cands.append(("k", tile_k))
        if not user_h and tile_h > 256:
            cands.append(("h", tile_h))
        if cands:
            which = max(cands, key=lambda c: c[1])[0]
            if which == "n":
                tile_n = _pick_tile(d_out_pad, max(128, tile_n // 2))
            elif which == "k":
                tile_k = _pick_tile(d_in_pad, max(128, tile_k // 2))
            else:
                tile_h = _pick_tile(h_pad, max(128, tile_h // 2))
        elif not user_m and tile_m > sublane:
            tile_m = max(sublane, _round_up(tile_m // 2, sublane))
        else:
            break
    return tile_m, tile_h, tile_k, tile_n


def _make_ffn_kernel(tile_k, compute_dtype, approx_gelu, acc_in_out):
    """Grid = (i, n, j, k):
         i : row tiles                      ("parallel")
         n : output-feature (D_out) tiles   ("parallel")
         j : hidden-dim (H) tiles           (reduction of the 2nd matmul)
         k : input-dim (D_in) tiles         (reduction of the 1st matmul)
    """

    def body(x_ref, w1_ref, b1_ref, w2_ref, b2_ref, o_ref, h_acc, out_acc):
        j = pl.program_id(2)
        k = pl.program_id(3)
        nj = pl.num_programs(2)
        nk = pl.num_programs(3)
        last_k = k == nk - 1

        # ---- first matmul: h = x @ w1 + b1, accumulated over k -------------
        @pl.when(k == 0)
        def _():
            # Fold the bias into the accumulator init; keeps the busy last-k
            # step free of the extra VALU add.
            h_acc[...] = jnp.broadcast_to(
                b1_ref[...].astype(jnp.float32), h_acc.shape)

        koff = pl.multiple_of(k * tile_k, 128)
        x_chunk = x_ref[:, pl.ds(koff, tile_k)]
        h_acc[...] += jnp.dot(x_chunk, w1_ref[...],
                              preferred_element_type=jnp.float32)

        # ---- on the last k step: GELU then accumulate the out tile over j --
        @pl.when(last_k & (j == 0))
        def _():
            out_acc[...] = jnp.zeros_like(out_acc)

        @pl.when(last_k)
        def _():
            h = h_acc[...]
            if approx_gelu:
                g = 0.5 * h * (1.0 + jnp.tanh(_TANH_C0 * (h + 0.044715 * h * h * h)))
            else:
                # Exact erf-based GELU == PyTorch nn.GELU() default.
                g = 0.5 * h * (1.0 + jax.lax.erf(h * _INV_SQRT2))
            out_acc[...] += jnp.dot(g.astype(compute_dtype), w2_ref[...],
                                    preferred_element_type=jnp.float32)

        @pl.when(last_k & (j == nj - 1))
        def _():
            o_ref[...] = (out_acc[...]
                          + b2_ref[...].astype(jnp.float32)).astype(o_ref.dtype)

    if acc_in_out:
        # f32 output: accumulate directly in o_ref (its block index is
        # constant across j,k) -> no out_acc scratch.
        def kernel(x_ref, w1_ref, b1_ref, w2_ref, b2_ref, o_ref, h_acc):
            body(x_ref, w1_ref, b1_ref, w2_ref, b2_ref, o_ref, h_acc, o_ref)
    else:
        def kernel(x_ref, w1_ref, b1_ref, w2_ref, b2_ref, o_ref, h_acc, out_acc):
            body(x_ref, w1_ref, b1_ref, w2_ref, b2_ref, o_ref, h_acc, out_acc)
    return kernel


def feedforward(x, w1, b1, w2, b2, *, matmul_dtype=jnp.bfloat16,
                tile_m=None, tile_h=None, tile_k=None, tile_n=None,
                approx_gelu=False):
    """GELU(x @ w1 + b1) @ w2 + b2  (PyTorch Linear -> GELU -> Linear).

    x: [..., D_in]; w1: [D_in, H]; b1: [H]; w2: [H, D_out]; b2: [D_out]
    (weights stored [in, out], i.e. transposed vs. PyTorch's [out, in]).

    matmul_dtype: dtype both matmuls run at on the MXU (default bf16,
    accumulation in f32, bias + GELU in f32).  Pass jnp.float32 for exact
    parity with a f32 PyTorch reference.  None -> use the input dtype.
    """
    orig_shape = x.shape
    if x.ndim != 2:
        x = x.reshape(-1, orig_shape[-1])

    M, D_in = x.shape
    H = w1.shape[1]
    D_out = w2.shape[1]
    out_dtype = x.dtype

    compute_dtype = jnp.dtype(out_dtype if matmul_dtype is None else matmul_dtype)
    ci = compute_dtype.itemsize
    oi = jnp.dtype(out_dtype).itemsize
    sublane = 8 if ci >= 4 else 16
    acc_in_out = (jnp.dtype(out_dtype) == jnp.dtype(jnp.float32))

    # ---- generation-aware VMEM sizing --------------------------------------
    vmem_cap = _vmem_capacity_bytes()
    vmem_limit = int(vmem_cap * 3 // 4)     # leave headroom for Mosaic scratch
    budget = int(vmem_cap * 0.60)           # target for block+scratch footprint

    # ---- pad every feature dim to a multiple of 128 (lane-dense blocks) ----
    d_in_pad = _round_up(D_in, 128)
    h_pad = _round_up(H, 128)
    d_out_pad = _round_up(D_out, 128)

    tile_m, tile_h, tile_k, tile_n = _auto_tiles(
        M, d_in_pad, h_pad, d_out_pad, ci, oi, vmem_cap, budget,
        sublane, acc_in_out, tile_m, tile_h, tile_k, tile_n)

    assert h_pad % tile_h == 0 and tile_h % 128 == 0
    assert d_in_pad % tile_k == 0 and tile_k % 128 == 0
    assert d_out_pad % tile_n == 0 and tile_n % 128 == 0
    assert tile_m % sublane == 0

    m_pad = _round_up(M, tile_m)
    grid_m = m_pad // tile_m
    grid_n = d_out_pad // tile_n
    grid_h = h_pad // tile_h
    grid_k = d_in_pad // tile_k
    grid = (grid_m, grid_n, grid_h, grid_k)

    # ---- host-side layout plumbing (dtype cast + zero padding) --------------
    xc = x.astype(compute_dtype)
    w1c = w1.astype(compute_dtype)
    w2c = w2.astype(compute_dtype)
    b1f = b1.astype(jnp.float32)
    b2f = b2.astype(jnp.float32)

    if m_pad != M or d_in_pad != D_in:
        xc = jnp.pad(xc, ((0, m_pad - M), (0, d_in_pad - D_in)))
    if d_in_pad != D_in or h_pad != H:
        w1c = jnp.pad(w1c, ((0, d_in_pad - D_in), (0, h_pad - H)))
    if h_pad != H:
        b1f = jnp.pad(b1f, (0, h_pad - H))
    if h_pad != H or d_out_pad != D_out:
        w2c = jnp.pad(w2c, ((0, h_pad - H), (0, d_out_pad - D_out)))
    if d_out_pad != D_out:
        b2f = jnp.pad(b2f, (0, d_out_pad - D_out))
    b1_2d = b1f.reshape(1, h_pad)
    b2_2d = b2f.reshape(1, d_out_pad)

    def _spec(shape, index_map, constant):
        # Blocks whose index never changes across the grid are DMA'd once;
        # single-buffer them to halve their resident VMEM footprint.
        if constant:
            return pl.BlockSpec(shape, index_map, pipeline_mode=pl.Buffered(1))
        return pl.BlockSpec(shape, index_map)

    in_specs = [
        # x: full-D_in row stripe, resident across (n, j, k) -> one DMA per i.
        _spec((tile_m, d_in_pad), lambda i, n, j, k: (i, 0),
              constant=(grid_m == 1)),
        _spec((tile_k, tile_h), lambda i, n, j, k: (k, j),
              constant=(grid_k == 1 and grid_h == 1)),
        _spec((1, tile_h), lambda i, n, j, k: (0, j),
              constant=(grid_h == 1)),
        _spec((tile_h, tile_n), lambda i, n, j, k: (j, n),
              constant=(grid_h == 1 and grid_n == 1)),
        _spec((1, tile_n), lambda i, n, j, k: (0, n),
              constant=(grid_n == 1)),
    ]
    out_spec = pl.BlockSpec((tile_m, tile_n), lambda i, n, j, k: (i, n))

    scratch = [pltpu.VMEM((tile_m, tile_h), jnp.float32)]      # h accumulator
    if not acc_in_out:
        scratch.append(pltpu.VMEM((tile_m, tile_n), jnp.float32))  # out acc

    # ---- cost estimate reflecting the real DMA re-streaming -----------------
    flops = 2 * m_pad * d_in_pad * h_pad * grid_n + 2 * m_pad * h_pad * d_out_pad
    transcendentals = m_pad * h_pad * grid_n
    bytes_accessed = int(
        m_pad * d_in_pad * ci                            # x streamed once
        + grid_m * grid_n * d_in_pad * h_pad * ci        # w1 per (i, n)
        + grid_m * h_pad * d_out_pad * ci                # w2 per i
        + grid_m * grid_n * h_pad * 4                    # b1
        + grid_m * d_out_pad * 4                         # b2
        + m_pad * d_out_pad * oi)                        # out written once

    kernel = _make_ffn_kernel(tile_k, compute_dtype, approx_gelu, acc_in_out)

    out = pl.pallas_call(
        kernel,
        out_shape=jax.ShapeDtypeStruct((m_pad, d_out_pad), out_dtype),
        grid_spec=pltpu.PrefetchScalarGridSpec(
            num_scalar_prefetch=0,
            grid=grid,
            in_specs=in_specs,
            out_specs=out_spec,
            scratch_shapes=scratch,
        ),
        compiler_params=pltpu.CompilerParams(
            dimension_semantics=("parallel", "parallel", "arbitrary", "arbitrary"),
            vmem_limit_bytes=vmem_limit,
        ),
        cost_estimate=pl.CostEstimate(
            flops=int(flops),
            transcendentals=int(transcendentals),
            bytes_accessed=bytes_accessed,
        ),
    )(xc, w1c, b1_2d, w2c, b2_2d)

    if m_pad != M or d_out_pad != D_out:
        out = out[:M, :D_out]
    if len(orig_shape) != 2:
        out = out.reshape(*orig_shape[:-1], D_out)
    return out


def _init_linear(key, fan_in, fan_out, dtype=jnp.float32):
    # Mimics PyTorch nn.Linear default init: U(-1/sqrt(fan_in), 1/sqrt(fan_in)).
    kw, kb = jax.random.split(key)
    bound = 1.0 / math.sqrt(fan_in)
    # Stored as [in, out] (transposed vs. PyTorch's [out, in]).
    w = jax.random.uniform(kw, (fan_in, fan_out), dtype, -bound, bound)
    b = jax.random.uniform(kb, (fan_out,), dtype, -bound, bound)
    return w, b


def _reference(x, w1, b1, w2, b2):
    # Pure-JAX f32 reference, same math path as the PyTorch forward.
    h = jnp.dot(x, w1, precision=jax.lax.Precision.HIGHEST) + b1
    h = 0.5 * h * (1.0 + jax.lax.erf(h * _INV_SQRT2))
    return jnp.dot(h, w2, precision=jax.lax.Precision.HIGHEST) + b2


if __name__ == "__main__":
    key = jax.random.PRNGKey(0)
    k_x, k_l1, k_l2, k_x2, k_l3, k_l4, k_x3 = jax.random.split(key, 7)

    # --- Test 1: small demo shapes, default bf16 MXU policy ------------------
    batch, input_dim, hidden_dim, output_dim = 8, 32, 64, 16
    x = jax.random.normal(k_x, (batch, input_dim), jnp.float32)
    w1, b1 = _init_linear(k_l1, input_dim, hidden_dim)
    w2, b2 = _init_linear(k_l2, hidden_dim, output_dim)

    out = jax.block_until_ready(feedforward(x, w1, b1, w2, b2))
    ref = _reference(x, w1, b1, w2, b2)
    assert out.shape == (batch, output_dim)
    assert jnp.allclose(out, ref, atol=3e-2, rtol=3e-2), float(jnp.max(jnp.abs(out - ref)))

    # --- Test 1b: exact-f32 matmul path (tight tolerance) --------------------
    out_f32 = jax.block_until_ready(
        feedforward(x, w1, b1, w2, b2, matmul_dtype=jnp.float32))
    assert jnp.allclose(out_f32, ref, atol=1e-4, rtol=1e-4)

    # --- Test 2: row/feature padding + all four grid axes > 1 ----------------
    M2, d_in2, h2, d_out2 = 136, 256, 384, 200
    x2 = jax.random.normal(k_x2, (M2, d_in2), jnp.float32)
    w1b, b1b = _init_linear(k_l3, d_in2, h2)
    w2b, b2b = _init_linear(k_l4, h2, d_out2)
    out2 = jax.block_until_ready(
        feedforward(x2, w1b, b1b, w2b, b2b,
                    tile_m=64, tile_h=128, tile_k=128, tile_n=128))
    ref2 = _reference(x2, w1b, b1b, w2b, b2b)
    assert out2.shape == (M2, d_out2)
    assert jnp.allclose(out2, ref2, atol=3e-2, rtol=3e-2)

    # --- Test 3: bf16 end-to-end (exercises the out_acc scratch path) --------
    xb = x.astype(jnp.bfloat16)
    w1h, b1h = w1.astype(jnp.bfloat16), b1.astype(jnp.bfloat16)
    w2h, b2h = w2.astype(jnp.bfloat16), b2.astype(jnp.bfloat16)
    out3 = jax.block_until_ready(feedforward(xb, w1h, b1h, w2h, b2h))
    ref3 = _reference(xb.astype(jnp.float32), w1h.astype(jnp.float32),
                      b1h.astype(jnp.float32), w2h.astype(jnp.float32),
                      b2h.astype(jnp.float32))
    assert out3.dtype == jnp.bfloat16 and out3.shape == (batch, output_dim)
    assert jnp.allclose(out3.astype(jnp.float32), ref3, atol=6e-2, rtol=6e-2)

    # --- Test 4: leading batch dims, like PyTorch nn.Linear ------------------
    x4 = jax.random.normal(k_x3, (2, 4, input_dim), jnp.float32)
    out4 = jax.block_until_ready(feedforward(x4, w1, b1, w2, b2))
    ref4 = _reference(x4.reshape(-1, input_dim), w1, b1, w2, b2).reshape(2, 4, output_dim)
    assert out4.shape == (2, 4, output_dim)
    assert jnp.allclose(out4, ref4, atol=3e-2, rtol=3e-2)

    print("KERNEL_OK")
</pallas_src>

<mosaic_0001>
module attributes {stable_mosaic.version = 11 : i64} {
  func.func @kernel(%arg0: i32, %arg1: i32, %arg2: i32, %arg3: i32, %arg4: memref<16x128xbf16, #tpu.memory_space<vmem>>, %arg5: memref<128x128xbf16, #tpu.memory_space<vmem>>, %arg6: memref<1x128xf32, #tpu.memory_space<vmem>>, %arg7: memref<128x128xbf16, #tpu.memory_space<vmem>>, %arg8: memref<1x128xf32, #tpu.memory_space<vmem>>, %arg9: memref<16x128xf32, #tpu.memory_space<vmem>>, %arg10: memref<16x128xf32, #tpu.memory_space<vmem>>) attributes {dimension_semantics = [#tpu.dimension_semantics<parallel>, #tpu.dimension_semantics<parallel>, #tpu.dimension_semantics<arbitrary>, #tpu.dimension_semantics<arbitrary>], iteration_bounds = array<i64: 1, 1, 1, 1>, scalar_prefetch = 0 : i64, scratch_operands = 1 : i64, tpu.core_type = #tpu.core_type<tc>, window_params = [{pipeline_mode = #tpu.pipeline_mode<synchronous>, transform_indices = @transform_0, window_bounds = array<i64: 16, 128>}, {pipeline_mode = #tpu.pipeline_mode<synchronous>, transform_indices = @transform_1, window_bounds = array<i64: 128, 128>}, {pipeline_mode = #tpu.pipeline_mode<synchronous>, transform_indices = @transform_2, window_bounds = array<i64: 1, 128>}, {pipeline_mode = #tpu.pipeline_mode<synchronous>, transform_indices = @transform_3, window_bounds = array<i64: 128, 128>}, {pipeline_mode = #tpu.pipeline_mode<synchronous>, transform_indices = @transform_4, window_bounds = array<i64: 1, 128>}, {transform_indices = @transform_5, window_bounds = array<i64: 16, 128>}]} {
    %c0_i32 = arith.constant 0 : i32
    %0 = arith.cmpi eq, %arg3, %c0_i32 : i32
    %c0_i32_0 = arith.constant 0 : i32
    %1 = arith.cmpi eq, %arg3, %c0_i32_0 : i32
    %2 = arith.extui %1 : i1 to i32
    %c0_i32_1 = arith.constant 0 : i32
    %3 = arith.cmpi ne, %2, %c0_i32_1 : i32
    scf.if %3 {
      %c0_13 = arith.constant 0 : index
      %c0_14 = arith.constant 0 : index
      %23 = vector.load %arg6[%c0_13, %c0_14] : memref<1x128xf32, #tpu.memory_space<vmem>>, vector<1x128xf32>
      %24 = vector.shape_cast %23 : vector<1x128xf32> to vector<1x128xf32>
      %25 = vector.broadcast %24 : vector<1x128xf32> to vector<16x128xf32>
      %c0_15 = arith.constant 0 : index
      %c0_16 = arith.constant 0 : index
      %26 = vector.load %arg10[%c0_15, %c0_16] : memref<16x128xf32, #tpu.memory_space<vmem>>, vector<16x128xf32>
      tpu.vector_store %arg10[%c0_15, %c0_16], %25 {strides = array<i32>} : memref<16x128xf32, #tpu.memory_space<vmem>>, vector<16x128xf32>,
    } else {
    }
    %c128_i32 = arith.constant 128 : i32
    %4 = arith.muli %arg3, %c128_i32 : i32
    %5 = tpu.assume_multiple %4, 128 : i32
    %c0 = arith.constant 0 : index
    %6 = arith.index_cast %5 : i32 to index
    %7 = vector.load %arg4[%c0, %6] : memref<16x128xbf16, #tpu.memory_space<vmem>>, vector<16x128xbf16>
    %c0_2 = arith.constant 0 : index
    %c0_3 = arith.constant 0 : index
    %8 = vector.load %arg10[%c0_2, %c0_3] : memref<16x128xf32, #tpu.memory_space<vmem>>, vector<16x128xf32>
    %c0_4 = arith.constant 0 : index
    %c0_5 = arith.constant 0 : index
    %9 = vector.load %arg5[%c0_4, %c0_5] : memref<128x128xbf16, #tpu.memory_space<vmem>>, vector<128x128xbf16>
    %cst = arith.constant dense<0.000000e+00> : vector<16x128xf32>
    %10 = tpu.matmul %7, %9, %cst {dimension_numbers = #tpu.dot_dimension_numbers<[1], [0], [0], [1], [0, 0, 1, 1], [], []>} : vector<16x128xbf16>, vector<128x128xbf16>, vector<16x128xf32> -> vector<16x128xf32>
    %11 = arith.addf %8, %10 : vector<16x128xf32>
    %c0_6 = arith.constant 0 : index
    %c0_7 = arith.constant 0 : index
    %12 = vector.load %arg10[%c0_6, %c0_7] : memref<16x128xf32, #tpu.memory_space<vmem>>, vector<16x128xf32>
    tpu.vector_store %arg10[%c0_6, %c0_7], %11 {strides = array<i32>} : memref<16x128xf32, #tpu.memory_space<vmem>>, vector<16x128xf32>,
    %c0_i32_8 = arith.constant 0 : i32
    %13 = arith.cmpi eq, %arg2, %c0_i32_8 : i32
    %14 = arith.andi %0, %13 : i1
    %15 = arith.extui %14 : i1 to i32
    %c0_i32_9 = arith.constant 0 : i32
    %16 = arith.cmpi ne, %15, %c0_i32_9 : i32
    scf.if %16 {
      %cst_13 = arith.constant 0.000000e+00 : f32
      %23 = vector.broadcast %cst_13 : f32 to vector<16x128xf32>
      %c0_14 = arith.constant 0 : index
      %c0_15 = arith.constant 0 : index
      %24 = vector.load %arg9[%c0_14, %c0_15] : memref<16x128xf32, #tpu.memory_space<vmem>>, vector<16x128xf32>
      tpu.vector_store %arg9[%c0_14, %c0_15], %23 {strides = array<i32>} : memref<16x128xf32, #tpu.memory_space<vmem>>, vector<16x128xf32>,
    } else {
    }
    %17 = arith.extui %0 : i1 to i32
    %c0_i32_10 = arith.constant 0 : i32
    %18 = arith.cmpi ne, %17, %c0_i32_10 : i32
    scf.if %18 {
      %c0_13 = arith.constant 0 : index
      %c0_14 = arith.constant 0 : index
      %23 = vector.load %arg10[%c0_13, %c0_14] : memref<16x128xf32, #tpu.memory_space<vmem>>, vector<16x128xf32>
      %cst_15 = arith.constant 5.000000e-01 : f32
      %24 = vector.broadcast %cst_15 : f32 to vector<16x128xf32>
      %25 = arith.mulf %24, %23 : vector<16x128xf32>
      %cst_16 = arith.constant 0.707106769 : f32
      %26 = vector.broadcast %cst_16 : f32 to vector<16x128xf32>
      %27 = arith.mulf %23, %26 : vector<16x128xf32>
      %28 = math.erf %27 : vector<16x128xf32>
      %cst_17 = arith.constant 1.000000e+00 : f32
      %29 = vector.broadcast %cst_17 : f32 to vector<16x128xf32>
      %30 = arith.addf %29, %28 : vector<16x128xf32>
      %31 = arith.mulf %25, %30 : vector<16x128xf32>
      %c0_18 = arith.constant 0 : index
      %c0_19 = arith.constant 0 : index
      %32 = vector.load %arg9[%c0_18, %c0_19] : memref<16x128xf32, #tpu.memory_space<vmem>>, vector<16x128xf32>
      %33 = arith.truncf %31 : vector<16x128xf32> to vector<16x128xbf16>
      %c0_20 = arith.constant 0 : index
      %c0_21 = arith.constant 0 : index
      %34 = vector.load %arg7[%c0_20, %c0_21] : memref<128x128xbf16, #tpu.memory_space<vmem>>, vector<128x128xbf16>
      %cst_22 = arith.constant dense<0.000000e+00> : vector<16x128xf32>
      %35 = tpu.matmul %33, %34, %cst_22 {dimension_numbers = #tpu.dot_dimension_numbers<[1], [0], [0], [1], [0, 0, 1, 1], [], []>} : vector<16x128xbf16>, vector<128x128xbf16>, vector<16x128xf32> -> vector<16x128xf32>
      %36 = arith.addf %32, %35 : vector<16x128xf32>
      %c0_23 = arith.constant 0 : index
      %c0_24 = arith.constant 0 : index
      %37 = vector.load %arg9[%c0_23, %c0_24] : memref<16x128xf32, #tpu.memory_space<vmem>>, vector<16x128xf32>
      tpu.vector_store %arg9[%c0_23, %c0_24], %36 {strides = array<i32>} : memref<16x128xf32, #tpu.memory_space<vmem>>, vector<16x128xf32>,
    } else {
    }
    %c0_i32_11 = arith.constant 0 : i32
    %19 = arith.cmpi eq, %arg2, %c0_i32_11 : i32
    %20 = arith.andi %0, %19 : i1
    %21 = arith.extui %20 : i1 to i32
    %c0_i32_12 = arith.constant 0 : i32
    %22 = arith.cmpi ne, %21, %c0_i32_12 : i32
    scf.if %22 {
      %c0_13 = arith.constant 0 : index
      %c0_14 = arith.constant 0 : index
      %23 = vector.load %arg9[%c0_13, %c0_14] : memref<16x128xf32, #tpu.memory_space<vmem>>, vector<16x128xf32>
      %c0_15 = arith.constant 0 : index
      %c0_16 = arith.constant 0 : index
      %24 = vector.load %arg8[%c0_15, %c0_16] : memref<1x128xf32, #tpu.memory_space<vmem>>, vector<1x128xf32>
      %25 = vector.broadcast %24 : vector<1x128xf32> to vector<16x128xf32>
      %26 = arith.addf %23, %25 : vector<16x128xf32>
      %c0_17 = arith.constant 0 : index
      %c0_18 = arith.constant 0 : index
      %27 = vector.load %arg9[%c0_17, %c0_18] : memref<16x128xf32, #tpu.memory_space<vmem>>, vector<16x128xf32>
      tpu.vector_store %arg9[%c0_17, %c0_18], %26 {strides = array<i32>} : memref<16x128xf32, #tpu.memory_space<vmem>>, vector<16x128xf32>,
    } else {
    }
    return
  }
  func.func @transform_0(%arg0: i32, %arg1: i32, %arg2: i32, %arg3: i32) -> (i32, i32) {
    %c0_i32 = arith.constant 0 : i32
    %c0_i32_0 = arith.constant 0 : i32
    return %arg0, %c0_i32 : i32, i32
  }
  func.func @transform_1(%arg0: i32, %arg1: i32, %arg2: i32, %arg3: i32) -> (i32, i32) {
    %c0_i32 = arith.constant 0 : i32
    return %arg3, %arg2 : i32, i32
  }
  func.func @transform_2(%arg0: i32, %arg1: i32, %arg2: i32, %arg3: i32) -> (i32, i32) {
    %c0_i32 = arith.constant 0 : i32
    %c0_i32_0 = arith.constant 0 : i32
    return %c0_i32, %arg2 : i32, i32
  }
  func.func @transform_3(%arg0: i32, %arg1: i32, %arg2: i32, %arg3: i32) -> (i32, i32) {
    %c0_i32 = arith.constant 0 : i32
    return %arg2, %arg1 : i32, i32
  }
  func.func @transform_4(%arg0: i32, %arg1: i32, %arg2: i32, %arg3: i32) -> (i32, i32) {
    %c0_i32 = arith.constant 0 : i32
    %c0_i32_0 = arith.constant 0 : i32
    return %c0_i32, %arg1 : i32, i32
  }
  func.func @transform_5(%arg0: i32, %arg1: i32, %arg2: i32, %arg3: i32) -> (i32, i32) {
    %c0_i32 = arith.constant 0 : i32
    return %arg0, %arg1 : i32, i32
  }
}

</mosaic_0001>

<bundles_post_ra>
// kernel: tpu_custom_call.1
= control target key start
LH: loop header
LB: loop body
LE: loop exit
PB: predicated region body
PF: predicated region fallthrough
CT: control target
= control target key end

     0   :  { %10 = vsyncpa [#allocation4], 0  ;;  %s773_s0 = inlined_call_operand.hbm [shape: bf16[16,128], index: 0, kind: input, shape index: {}]   ;;  %s774_s1 = inlined_call_operand.hbm [shape: bf16[128,128], index: 1, kind: input, shape index: {}]   ;;  %s775_s2 = inlined_call_operand.hbm [shape: f32[1,128], index: 2, kind: input, shape index: {}]   ;;  %s776_s3 = inlined_call_operand.hbm [shape: bf16[128,128], index: 3, kind: input, shape index: {}]   ;;  %s777_s4 = inlined_call_operand.hbm [shape: f32[1,128], index: 4, kind: input, shape index: {}]   ;;  %s778_s5 = inlined_call_operand.hbm [shape: f32[16,128], index: 5, kind: output, shape index: {}]  }
   0x1   :  { %11 = vsyncpa [#allocation7], 0 }
   0x2   :  { %12 = vsyncpa [#allocation10], 0 }
   0x3   :  { %13 = vsyncpa [#allocation5], 0  ;;  %s643_s18 = smov [#allocation6]   ;;  %s644_s20 = smov [#allocation9]  }
   0x4   :  { %s31_s19 = sshll.u32 %s643_s18, 4  ;;  %s53_s21 = sshll.u32 %s644_s20, 4  ;;  %s32_s19 = int_to_ptr.vmem [resolvable:$true] %s31_s19  ;;  %s685_s21 = int_to_ptr.vmem [resolvable:$true] %s53_s21 }
   0x5   :  { %s503_s24 = scalar_lea.hbm %s774_s1, 1024 }
   0x6   :  { %p504_p0 = scmp.ne.s32.totalorder %s774_s1, %s503_s24  ;;  %p507_p1 = scmp.lt.u32.totalorder %s503_s24, %s774_s1 }
   0x8   :  { %p509_p2 = pnand %p507_p1, %p504_p0 }
   0xa   :  { %512 = shalt.err (!%p509_p2)
}
   0xb   :  { %s513_s29 = scalar_lea.vmem %s32_s19, 1024  ;;  %p518_p4 = scmp.lt.s32.totalorder %s32_s19, %s32_s19 }
   0xc   :  { %p514_p3 = scmp.ne.s32.totalorder %s32_s19, %s513_s29  ;;  %p519_p5 = scmp.lt.s32.totalorder %s513_s29, %s513_s29 }
   0xe   :  { %p520_p6 = por %p519_p5, %p518_p4 }
  0x10   :  { %p521_p7 = pnand %p520_p6, %p514_p3 }
  0x12   :  { %524 = shalt.err (!%p521_p7)
}
  0x13   :  { %s645_s30 = smov 64   ;;  %s646_s6 = smov 4  }
  0x14   :  { %37 = dma.hbm_to_vmem [thread:$0]  %s774_s1, 1024, %s32_s19, [#allocation7], %s645_s30, %s645_s30, %s646_s6  }
  0x15   :  { %s525_s11 = scalar_lea.hbm %s776_s3, 1024 }
  0x16   :  { %p526_p8 = scmp.ne.s32.totalorder %s776_s3, %s525_s11  ;;  %p529_p9 = scmp.lt.u32.totalorder %s525_s11, %s776_s3 }
  0x18   :  { %p531_p10 = pnand %p529_p9, %p526_p8 }
  0x1a   :  { %534 = shalt.err (!%p531_p10)
}
  0x1b   :  { %s535_s16 = scalar_lea.vmem %s685_s21, 1024  ;;  %p540_p12 = scmp.lt.s32.totalorder %s685_s21, %s685_s21 }
  0x1c   :  { %p536_p11 = scmp.ne.s32.totalorder %s685_s21, %s535_s16  ;;  %p541_p13 = scmp.lt.s32.totalorder %s535_s16, %s535_s16 }
  0x1e   :  { %p542_p0 = por %p541_p13, %p540_p12 }
  0x20   :  { %p543_p1 = pnand %p542_p0, %p536_p11 }
  0x22   :  { %546 = shalt.err (!%p543_p1)
}
  0x23   :  { %59 = dma.hbm_to_vmem [thread:$0]  %s776_s3, 1024, %s685_s21, [#allocation10], %s645_s30, %s645_s30, %s646_s6  }
  0x24   :  { %s647_s18 = smov [#allocation3]   ;;  %s648_s20 = smov [#allocation8]  }
  0x25   :  { %s19_s19 = sshll.u32 %s647_s18, 4  ;;  %s44_s22 = sshll.u32 %s648_s20, 4  ;;  %s20_s19 = int_to_ptr.vmem [resolvable:$true] %s19_s19  ;;  %s45_s22 = int_to_ptr.vmem [resolvable:$true] %s44_s22 }
  0x26   :  { %s547_s25 = scalar_lea.hbm %s773_s0, 128 }
  0x27   :  { %p548_p2 = scmp.ne.s32.totalorder %s773_s0, %s547_s25  ;;  %p551_p3 = scmp.lt.u32.totalorder %s547_s25, %s773_s0 }
  0x29   :  { %p553_p4 = pnand %p551_p3, %p548_p2 }
  0x2b   :  { %556 = shalt.err (!%p553_p4)
}
  0x2c   :  { %s557_s3 = scalar_lea.vmem %s20_s19, 128  ;;  %p562_p6 = scmp.lt.s32.totalorder %s20_s19, %s20_s19 }
  0x2d   :  { %p558_p5 = scmp.ne.s32.totalorder %s20_s19, %s557_s3  ;;  %p563_p7 = scmp.lt.s32.totalorder %s557_s3, %s557_s3 }
  0x2f   :  { %p564_p8 = por %p563_p7, %p562_p6 }
  0x31   :  { %p565_p9 = pnand %p564_p8, %p558_p5 }
  0x33   :  { %568 = shalt.err (!%p565_p9)
}
  0x34   :  { %25 = dma.hbm_to_vmem [thread:$0]  %s773_s0, 128, %s20_s19, [#allocation4], %s645_s30, %s645_s30, %s646_s6  }
  0x35   :  { %s569_s10 = scalar_lea.hbm %s775_s2, 16 }
  0x36   :  { %p570_p10 = scmp.ne.s32.totalorder %s775_s2, %s569_s10  ;;  %p573_p11 = scmp.lt.u32.totalorder %s569_s10, %s775_s2 }
  0x38   :  { %p575_p12 = pnand %p573_p11, %p570_p10 }
  0x3a   :  { %578 = shalt.err (!%p575_p12)
}
  0x3b   :  { %s579_s15 = scalar_lea.vmem %s45_s22, 16  ;;  %s583_s16 = scalar_lea.vmem %s45_s22, 32 }
  0x3c   :  { %p580_p13 = scmp.ne.s32.totalorder %s45_s22, %s579_s15  ;;  %p584_p0 = scmp.lt.s32.totalorder %s45_s22, %s45_s22 }
  0x3d   :  { %p585_p1 = scmp.lt.s32.totalorder %s583_s16, %s579_s15 }
  0x3f   :  { %p586_p2 = por %p585_p1, %p584_p0 }
  0x41   :  { %p587_p3 = pnand %p586_p2, %p580_p13 }
  0x43   :  { %590 = shalt.err (!%p587_p3)
}
  0x44   :  { %47 = dma.hbm_to_vmem [thread:$0]  %s775_s2, 16, %s45_s22, [#allocation7]  }
  0x45   :  { %s649_s6 = smov [#allocation11]   ;;  %s591_s19 = scalar_lea.hbm %s777_s4, 16 }
  0x46   :  { %s66_s1 = sshll.u32 %s649_s6, 4  ;;  %p592_p4 = scmp.ne.s32.totalorder %s777_s4, %s591_s19  ;;  %s67_s1 = int_to_ptr.vmem [resolvable:$true] %s66_s1 }
  0x47   :  { %p595_p5 = scmp.lt.u32.totalorder %s591_s19, %s777_s4 }
  0x49   :  { %p597_p6 = pnand %p595_p5, %p592_p4 }
  0x4b   :  { %600 = shalt.err (!%p597_p6)
}
  0x4c   :  { %s601_s26 = scalar_lea.vmem %s67_s1, 16  ;;  %s605_s2 = scalar_lea.vmem %s67_s1, 32 }
  0x4d   :  { %p602_p7 = scmp.ne.s32.totalorder %s67_s1, %s601_s26  ;;  %p606_p8 = scmp.lt.s32.totalorder %s67_s1, %s67_s1 }
  0x4e   :  { %p607_p9 = scmp.lt.s32.totalorder %s605_s2, %s601_s26 }
  0x50   :  { %p608_p10 = por %p607_p9, %p606_p8 }
  0x52   :  { %p609_p11 = pnand %p608_p10, %p602_p7 }
  0x54   :  { %612 = shalt.err (!%p609_p11)
}
  0x55   :  { %69 = dma.hbm_to_vmem [thread:$0]  %s777_s4, 16, %s67_s1, [#allocation10]  }
  0x56   :  { %635 = dma.done.wait [#allocation4], 128  }
  0x57   :  { %636 = vsyncadd [#allocation4], 4294967168 }
  0x58   :  { %637 = dma.done.wait [#allocation7], 1040  }
  0x59   :  { %638 = vsyncadd [#allocation7], 4294966256 }
  0x5a   :  { %639 = dma.done.wait [#allocation10], 1040  }
  0x5b   :  { %640 = vsyncadd [#allocation10], 4294966256  ;;  %v650_v0 = vmov 0.0   ;;  %vm651_vm0 = vmmov 0   ;;  %v482_v1 = vld [vmem:[#allocation6] sm:$0xff]   ;;  %v483_v2 = vld [vmem:[#allocation6 + $0x8] sm:$0xff]  }
  0x5c   :  { %430 = vmatprep.subr.bf16.mxu0 %v650_v0  ;;  %446 = vmatprep.mubr.msk.bf16.mxu0 %vm651_vm0, %v650_v0  ;;  %v484_v3 = vld [vmem:[#allocation6 + $0x10] sm:$0xff]   ;;  %v491_v4 = vld [vmem:[#allocation9] sm:$0xff]   ;;  %v485_v5 = vld [vmem:[#allocation6 + $0x18] sm:$0xff]   ;;  %s652_s4 = smov [#allocation12]  }
  0x5d   :  { %450 = vmatprep.subr.bf16.mxu1 %v650_v0  ;;  %466 = vmatprep.mubr.msk.bf16.mxu1 %vm651_vm0, %v650_v0  ;;  %v492_v6 = vld [vmem:[#allocation9 + $0x8] sm:$0xff]   ;;  %v486_v7 = vld [vmem:[#allocation6 + $0x20] sm:$0xff]   ;;  %v489_v10 = vld [vmem:[#allocation6 + $0x38] sm:$0xff]   ;;  %s377_s28 = sshll.u32 %s652_s4, 4  ;;  %s378_s28 = int_to_ptr.vmem [resolvable:$true] %s377_s28 }
  0x5e   :  { %431 = vmatpush3.bf16.msra.mxu0 %v482_v1  ;;  %451 = vmatpush3.bf16.msra.mxu1 %v491_v4  ;;  %v487_v8 = vld [vmem:[#allocation6 + $0x28] sm:$0xff]   ;;  %v488_v9 = vld [vmem:[#allocation6 + $0x30] sm:$0xff]   ;;  %v490_v11 = vld [vmem:[#allocation3] sm:$0xff]   ;;  %s613_s29 = scalar_lea.vmem %s378_s28, 256  ;;  %p618_p13 = scmp.lt.s32.totalorder %s378_s28, %s378_s28 }
  0x5f   :  { %432 = vmatprep.subr.bf16.mxu0 %v650_v0  ;;  %452 = vmatprep.subr.bf16.mxu1 %v650_v0  ;;  %v493_v12 = vld [vmem:[#allocation9 + $0x10] sm:$0xff]   ;;  %v494_v13 = vld [vmem:[#allocation9 + $0x18] sm:$0xff]   ;;  %v495_v14 = vld [vmem:[#allocation9 + $0x20] sm:$0xff]   ;;  %p614_p12 = scmp.ne.s32.totalorder %s378_s28, %s613_s29  ;;  %p619_p0 = scmp.lt.s32.totalorder %s613_s29, %s613_s29 }
  0x60   :  { %v496_v15 = vld [vmem:[#allocation9 + $0x28] sm:$0xff]   ;;  %v497_v16 = vld [vmem:[#allocation9 + $0x30] sm:$0xff]   ;;  %v498_v17 = vld [vmem:[#allocation9 + $0x38] sm:$0xff]  }
  0x61   :  { %v393_v18 = vld [vmem:[#allocation8] ss:$0 sm:$0xff]  ;;  %v411_v37 = vld [vmem:[#allocation11] ss:$0 sm:$0xff]  ;;  %p620_p1 = por %p619_p0, %p618_p13 }
  0x62   :  { %433 = vmatpush3.bf16.msra.mxu0 %v483_v2  ;;  %453 = vmatpush3.bf16.msra.mxu1 %v492_v6 }
  0x63   :  { %434 = vmatprep.subr.bf16.mxu0 %v650_v0  ;;  %454 = vmatprep.subr.bf16.mxu1 %v650_v0  ;;  %p621_p2 = pnand %p620_p1, %p614_p12 }
  0x66   :  { %435 = vmatpush3.bf16.msra.mxu0 %v484_v3  ;;  %455 = vmatpush3.bf16.msra.mxu1 %v493_v12 }
  0x67   :  { %436 = vmatprep.subr.bf16.mxu0 %v650_v0  ;;  %456 = vmatprep.subr.bf16.mxu1 %v650_v0 }
  0x6a   :  { %437 = vmatpush3.bf16.msra.mxu0 %v485_v5  ;;  %457 = vmatpush3.bf16.msra.mxu1 %v494_v13 }
  0x6b   :  { %438 = vmatprep.subr.bf16.mxu0 %v650_v0  ;;  %458 = vmatprep.subr.bf16.mxu1 %v650_v0 }
  0x6e   :  { %439 = vmatpush3.bf16.msra.mxu0 %v486_v7  ;;  %459 = vmatpush3.bf16.msra.mxu1 %v495_v14 }
  0x6f   :  { %440 = vmatprep.subr.bf16.mxu0 %v650_v0  ;;  %460 = vmatprep.subr.bf16.mxu1 %v650_v0 }
  0x72   :  { %441 = vmatpush3.bf16.msra.mxu0 %v487_v8  ;;  %461 = vmatpush3.bf16.msra.mxu1 %v496_v15 }
  0x73   :  { %442 = vmatprep.subr.bf16.mxu0 %v650_v0  ;;  %462 = vmatprep.subr.bf16.mxu1 %v650_v0 }
  0x76   :  { %443 = vmatpush3.bf16.msra.mxu0 %v488_v9  ;;  %463 = vmatpush3.bf16.msra.mxu1 %v497_v16 }
  0x77   :  { %444 = vmatprep.subr.bf16.mxu0 %v650_v0  ;;  %464 = vmatprep.subr.bf16.mxu1 %v650_v0 }
  0x7a   :  { %445 = vmatpush3.bf16.msra.mxu0 %v489_v10  ;;  %465 = vmatpush3.bf16.msra.mxu1 %v498_v17 }
  0x7d   :  { %447 = vmatmul.mubr.bf16.vlgmr.msra.gmra.mrb[0].mxu0 %v490_v11 }
 0x150   :  { %v212_v19 = vpop.f32.mrb[0].mxu0 }
 0x151   :  { %v219_v20 = vadd.f32 %v393_v18, %v212_v19  ;;  %v448_v21 = vpop.f32.mrb[1].mxu0 }
 0x152   :  { %v215_v22 = vpop.f32.mrb[2].mxu0 }
 0x153   :  { %v237_v23 = vmul.f32 0.70710677, %v219_v20  ;;  %v220_v24 = vadd.f32 %v393_v18, %v215_v22  ;;  %v449_v25 = vpop.f32.mrb[3].mxu0  ;;  %v235_v30 = vmul.f32 0.5, %v219_v20 }
 0x155   :  { %499 = verf.f32 %v237_v23  ;;  %v238_v26 = vmul.f32 0.70710677, %v220_v24  ;;  %v236_v31 = vmul.f32 0.5, %v220_v24 }
 0x157   :  { %501 = verf.f32 %v238_v26 }
 0x15f   :  { %v500_v27 = vpop.eup %499 }
 0x160   :  { %v241_v28 = vadd.f32 1.0, %v500_v27 }
 0x161   :  { %v502_v29 = vpop.eup %501 }
 0x162   :  { %v242_v32 = vadd.f32 1.0, %v502_v29  ;;  %v243_v33 = vmul.f32 %v241_v28, %v235_v30 }
 0x164   :  { %v244_v34 = vmul.f32 %v242_v32, %v236_v31 }
 0x166   :  { %v247_v35 = vpack.c.bf16 %v244_v34, %v243_v33 }
 0x168   :  { %467 = vmatmul.mubr.bf16.vlgmr.msra.gmra.mrb[0].mxu1 %v247_v35 }
 0x23b   :  { %v346_v36 = vpop.f32.mrb[0].mxu1 }
 0x23c   :  { %v468_v38 = vpop.f32.mrb[1].mxu1  ;;  %v368_v41 = vadd.f32 %v411_v37, %v346_v36 }
 0x23d   :  { %v349_v39 = vpop.f32.mrb[2].mxu1 }
 0x23e   :  { %v469_v40 = vpop.f32.mrb[3].mxu1  ;;  %v369_v42 = vadd.f32 %v411_v37, %v349_v39  ;;  %370 = vst [vmem:[#allocation12] sm:$0xff] %v368_v41 }
 0x240   :  { %371 = vst [vmem:[#allocation12 + $0x8] sm:$0xff] %v369_v42 }
 0x241   :  { %624 = shalt.err (!%p621_p2)
}
 0x242   :  { %s625_s7 = scalar_lea.hbm %s778_s5, 256 }
 0x243   :  { %p626_p3 = scmp.ne.s32.totalorder %s778_s5, %s625_s7  ;;  %p629_p4 = scmp.lt.u32.totalorder %s625_s7, %s778_s5 }
 0x245   :  { %p631_p5 = pnand %p629_p4, %p626_p3 }
 0x247   :  { %634 = shalt.err (!%p631_p5)
}
 0x248   :  { %s653_s12 = smov 128   ;;  %s654_s13 = smov 8  }
 0x249   :  { %383 = dma.vmem_to_hbm [thread:$0]  %s378_s28, 256, %s778_s5, [#allocation5], %s653_s12, %s653_s12, %s654_s13  }
 0x24a   :  { %641 = dma.done.wait [#allocation5], 256  }
 0x24b   :  { %642 = vsyncadd [#allocation5], 4294967040 }
 0x24c   :  { %387 = vsyncpa [#allocation4], 1 }
 0x24d   :  { %388 = vsyncpa [#allocation7], 1 }
 0x24e   :  { %389 = vsyncpa [#allocation10], 1 }
 0x24f   :  { %390 = vsyncpa [#allocation5], 1 }

</bundles_post_ra>
